<compile_context>
chip_gen: v7x
topology: tpu7x:2x2x1
jax: 0.10.0
libtpu: 0.0.40
codegen_flags: <defaults>
</compile_context>

<pallas_src>
import functools
import math

import jax
import jax.numpy as jnp
import numpy as np
from jax.experimental import pallas as pl
from jax.experimental.pallas import tpu as pltpu


# ---------------------------------------------------------------------------
# Helpers
# ---------------------------------------------------------------------------
def _rotate_left(x, s):
    """Circular left rotation along the last axis: out[:, j] = x[:, (j+s) % N]."""
    if s == 0:
        return x
    # TODO(synk): verify with pl.lower_as_mlir that this slice+concat lowers to
    # an XLU lane rotate; if it materializes copies, switch to pltpu.roll with
    # the equivalent (direction-checked) shift.
    return jnp.concatenate([x[:, s:], x[:, :s]], axis=1)


def _pick_heads_per_block(num_heads, d_k):
    """Heads-per-grid-step so the lane (last) block dim is 128/256-wide when
    possible; fall back to all heads (block == full feature dim, always legal
    w.r.t. the (8,128) BlockSpec rule)."""
    divisors = [h for h in range(1, num_heads + 1) if num_heads % h == 0]
    for target in (256, 128):
        for h in divisors:
            if h * d_k == target:
                return h
    for h in divisors:
        if (h * d_k) % 128 == 0 and h * d_k <= 512:
            return h
    return num_heads


def _pick_q_tile(seq_len, max_tile=256):
    """Query-tile size: a divisor of T that is a multiple of 8 and <= max_tile,
    or T itself (full dim is always a legal block)."""
    if seq_len <= max_tile:
        return seq_len
    for t in range(max_tile, 7, -8):
        if seq_len % t == 0:
            return t
    return seq_len


def _vmem_limit_bytes():
    """Per-generation scoped-VMEM limit (v5e/v6e: ~96 MiB, v7x: ~48 MiB)."""
    try:
        cap = pltpu.get_tpu_info().vmem_capacity_bytes
    except Exception:
        cap = 64 * 1024 * 1024
    return int(min(cap * 3 // 4, 100 * 1024 * 1024))


# ---------------------------------------------------------------------------
# Pallas kernel: one grid step == one (head-group, batch, query-tile) block.
# ---------------------------------------------------------------------------
def _disentangled_attn_kernel(q_ref, k_ref, v_ref, pk_ref, pq_ref, o_ref, *,
                              d_k, seq_len, q_tile):
    T, tq = seq_len, q_tile
    W = T + tq                                   # positional window width
    qt = pl.program_id(2)

    q = q_ref[0]                                 # (tq, blk) bf16, pre-scaled
    k = k_ref[0]                                 # (T,  blk) bf16
    v = v_ref[0]                                 # (T,  blk) bf16

    if tq == T:
        # Single q-tile: fully static fast path (also the tested path).
        kq = k                                   # K rows of this query tile
        pk_win = pk_ref[...]                     # (2T, blk)
        pq_win = pq_ref[...]
    else:
        i0 = qt * tq
        c0 = (T - tq) - i0                       # window start in the (2T,...) table
        if tq % 8 == 0 and T % 8 == 0:
            i0 = pl.multiple_of(i0, 8)
            c0 = pl.multiple_of(c0, 8)
        kq = k_ref[0, pl.ds(i0, tq), :]          # p2c pairs pos_query with K[i]
        pk_win = pk_ref[pl.ds(c0, W), :]         # (W, blk)
        pq_win = pq_ref[pl.ds(c0, W), :]

    hb = q.shape[-1] // d_k

    # Shear bookkeeping: within a q-tile, row r needs a left rotation by
    # tq-1-r (independent of the tile index).  Masks hoisted out of the
    # per-head loop and pre-broadcast to full shape.
    row = jax.lax.broadcasted_iota(jnp.int32, (tq, 1), 0)
    shift = (tq - 1) - row                       # (tq, 1)
    bits = []
    bit = 0
    while (1 << bit) <= tq - 1:
        bits.append(bit)
        bit += 1
    masks = [jnp.broadcast_to(((shift >> b) & 1) == 1, (tq, W)) for b in bits]

    for h in range(hb):
        sl = slice(h * d_k, (h + 1) * d_k)
        q_h, k_h, v_h, kq_h = q[:, sl], k[:, sl], v[:, sl], kq[:, sl]

        # content-to-content scores (scale already folded into q)
        scores = jnp.dot(q_h, k_h.T, preferred_element_type=jnp.float32)   # (tq, T)

        # Positional bias: one matmul with contraction depth 2*dk.
        #   g[r, c] = Q[i]·pos_key[bucket(c')] + K[i]·pos_query[bucket(c')]
        qk_h = jnp.concatenate([q_h, kq_h], axis=-1)                       # (tq, 2dk)
        pw_h = jnp.concatenate([pk_win[:, sl], pq_win[:, sl]], axis=-1)    # (W, 2dk)
        g = jnp.dot(qk_h, pw_h.T, preferred_element_type=jnp.float32)      # (tq, W)

        # bf16 shear: bias[r, j] = g[r, j + (tq-1-r)]  (log2(tq) conditional
        # rotations; circular wrap never reaches the first T columns).
        g = g.astype(jnp.bfloat16)
        for b_idx, m in zip(bits, masks):
            g = jnp.where(m, _rotate_left(g, 1 << b_idx), g)
        bias = g[:, :T].astype(jnp.float32)

        att = scores + bias
        att = att - jnp.max(att, axis=-1, keepdims=True)
        p = jnp.exp(att)
        denom = jnp.sum(p, axis=-1, keepdims=True)
        # TODO(synk): attention_dropout / pos_dropout omitted (eval-mode identity).
        ctx = jnp.dot(p.astype(jnp.bfloat16), v_h,
                      preferred_element_type=jnp.float32)                  # (tq, dk)
        ctx = ctx * pl.reciprocal(denom, approx=True)   # normalize after PV
        o_ref[0, :, sl] = ctx.astype(o_ref.dtype)


def disentangled_attention_core(q, k, v, pk_exp, pq_exp, *, num_heads, d_k,
                                heads_per_block=None, q_tile=None):
    """q/k/v: (B, T, H*dk) bf16 (q pre-scaled); pk_exp/pq_exp: (2T, H*dk) bf16
    positional tables pre-gathered by relative-distance bucket (pq pre-scaled)."""
    B, T, C = q.shape
    two_t = pk_exp.shape[0]
    hb = heads_per_block or _pick_heads_per_block(num_heads, d_k)
    assert num_heads % hb == 0
    n_groups = num_heads // hb
    blk = hb * d_k

    tq = q_tile or _pick_q_tile(T)
    assert T % tq == 0
    n_qt = T // tq

    kernel = functools.partial(_disentangled_attn_kernel, d_k=d_k,
                               seq_len=T, q_tile=tq)
    return pl.pallas_call(
        kernel,
        out_shape=jax.ShapeDtypeStruct((B, T, C), jnp.bfloat16),
        grid=(n_groups, B, n_qt),
        in_specs=[
            pl.BlockSpec((1, tq, blk), lambda g, b, qt: (b, qt, g)),   # Q tile
            pl.BlockSpec((1, T, blk), lambda g, b, qt: (b, 0, g)),     # K (resident over qt)
            pl.BlockSpec((1, T, blk), lambda g, b, qt: (b, 0, g)),     # V (resident over qt)
            pl.BlockSpec((two_t, blk), lambda g, b, qt: (0, g)),       # pos_key   (resident over b, qt)
            pl.BlockSpec((two_t, blk), lambda g, b, qt: (0, g)),       # pos_query (resident over b, qt)
        ],
        out_specs=pl.BlockSpec((1, tq, blk), lambda g, b, qt: (b, qt, g)),
        compiler_params=pltpu.CompilerParams(
            dimension_semantics=("parallel", "parallel", "parallel"),
            vmem_limit_bytes=_vmem_limit_bytes()),
    )(q, k, v, pk_exp, pq_exp)


# ---------------------------------------------------------------------------
# Module-level forward (glue in plain JAX, hot path in the kernel).
# ---------------------------------------------------------------------------
def _linear(x, w, b):
    return x @ w + b


def disentangled_self_attention_forward(x, params, *, num_heads, max_pos):
    B, T, C = x.shape
    H, dk, P = num_heads, C // num_heads, max_pos
    scale = 1.0 / math.sqrt(dk * 3.0)            # scale_factor = 1 + c2p + p2c

    Q = _linear(x, params["wq"], params["bq"]) * scale   # fold scale into Q (f32)
    K = _linear(x, params["wk"], params["bk"])
    V = _linear(x, params["wv"], params["bv"])

    rel_emb = params["rel_emb"]                                    # (2P, C)
    pos_key = _linear(rel_emb, params["wpk"], params["bpk"])       # (2P, C)
    pos_query = _linear(rel_emb, params["wpq"], params["bpq"]) * scale

    # Pre-gather the positional tables by relative-distance bucket.
    # The module's bucket (double-clipped, matching the PyTorch code exactly):
    #   bucket(d) = clip(clip(d + P, 0, 2P-1) + P, 0, 2P-1),  d = j - i.
    d_vals = jnp.arange(-(T - 1), T)                               # (2T-1,)
    buckets = jnp.clip(jnp.clip(d_vals + P, 0, 2 * P - 1) + P, 0, 2 * P - 1)
    pk_exp = pos_key[buckets]                                      # (2T-1, C)
    pq_exp = pos_query[buckets]
    # Pad to (2T, C); the padded row is never read for valid outputs.
    pk_exp = jnp.concatenate([pk_exp, pk_exp[-1:]], axis=0)
    pq_exp = jnp.concatenate([pq_exp, pq_exp[-1:]], axis=0)

    bf16 = jnp.bfloat16
    ctx = disentangled_attention_core(
        Q.astype(bf16), K.astype(bf16), V.astype(bf16),
        pk_exp.astype(bf16), pq_exp.astype(bf16),
        num_heads=H, d_k=dk)                                       # (B, T, C) bf16
    return _linear(ctx.astype(jnp.float32), params["wo"], params["bo"])


# ---------------------------------------------------------------------------
# Pure-JAX reference (literal gather semantics of the PyTorch module), f32.
# ---------------------------------------------------------------------------
def _split_heads(t, B, T, H, dk):
    return t.reshape(B, T, H, dk).transpose(0, 2, 1, 3).reshape(B * H, T, dk)


def reference_forward(x, params, *, num_heads, max_pos):
    B, T, C = x.shape
    H, dk, P = num_heads, C // num_heads, max_pos
    BH = B * H
    Qh = _split_heads(_linear(x, params["wq"], params["bq"]), B, T, H, dk)
    Kh = _split_heads(_linear(x, params["wk"], params["bk"]), B, T, H, dk)
    Vh = _split_heads(_linear(x, params["wv"], params["bv"]), B, T, H, dk)

    rel_emb = params["rel_emb"]
    pos_key = _linear(rel_emb, params["wpk"], params["bpk"]).reshape(2 * P, H, dk).transpose(1, 0, 2)
    pos_query = _linear(rel_emb, params["wpq"], params["bpq"]).reshape(2 * P, H, dk).transpose(1, 0, 2)
    pos_key = jnp.tile(pos_key, (B, 1, 1))              # (BH, 2P, dk)
    pos_query = jnp.tile(pos_query, (B, 1, 1))

    ctx = jnp.arange(T)[:, None]
    mem = jnp.arange(T)[None, :]
    rel = jnp.clip(mem - ctx + P, 0, 2 * P - 1)         # build_relative_position
    rel_pos = jnp.clip(rel + P, 0, 2 * P - 1)           # disentangled_attention_bias

    scale = 1.0 / math.sqrt(dk * 3)
    scores = jnp.einsum("bid,bjd->bij", Qh, Kh) * scale

    c2p_full = jnp.einsum("bid,brd->bir", Qh, pos_key) * scale          # (BH, T, 2P)
    idx = jnp.broadcast_to(rel_pos[None], (BH, T, T))
    c2p = jnp.take_along_axis(c2p_full, idx, axis=2)

    p2c_full = jnp.einsum("brd,bjd->brj", pos_query, Kh) * scale        # (BH, 2P, T)
    idx2 = jnp.broadcast_to(rel_pos.T[None], (BH, T, T))
    p2c = jnp.take_along_axis(p2c_full, idx2, axis=1).transpose(0, 2, 1)

    att = scores + c2p + p2c
    probs = jax.nn.softmax(att, axis=-1)
    ctxl = jnp.einsum("bij,bjd->bid", probs, Vh)
    ctxl = ctxl.reshape(B, H, T, dk).transpose(0, 2, 1, 3).reshape(B, T, C)
    return _linear(ctxl, params["wo"], params["bo"])


# ---------------------------------------------------------------------------
# Deterministic parameter init (synthetic, mirrors the module's shapes).
# ---------------------------------------------------------------------------
def init_params(key, d_model, max_pos):
    C = d_model
    ks = jax.random.split(key, 13)
    w = lambda k, shape: jax.random.normal(k, shape, dtype=jnp.float32) * 0.05
    return {
        "wq": w(ks[0], (C, C)), "bq": w(ks[1], (C,)),
        "wk": w(ks[2], (C, C)), "bk": w(ks[3], (C,)),
        "wv": w(ks[4], (C, C)), "bv": w(ks[5], (C,)),
        "wo": w(ks[6], (C, C)), "bo": w(ks[7], (C,)),
        "wpk": w(ks[8], (C, C)), "bpk": w(ks[9], (C,)),
        "wpq": w(ks[10], (C, C)), "bpq": w(ks[11], (C,)),
        "rel_emb": jax.random.normal(ks[12], (2 * max_pos, C), dtype=jnp.float32),
    }


if __name__ == "__main__":
    B, T, d_model, num_heads, max_pos = 2, 8, 32, 4, 16

    key = jax.random.PRNGKey(0)
    kx, kp = jax.random.split(key)
    x = jax.random.normal(kx, (B, T, d_model), dtype=jnp.float32)
    params = init_params(kp, d_model, max_pos)

    fwd = jax.jit(functools.partial(disentangled_self_attention_forward,
                                    num_heads=num_heads, max_pos=max_pos))
    out = jax.block_until_ready(fwd(x, params))

    ref = jax.block_until_ready(
        reference_forward(x, params, num_heads=num_heads, max_pos=max_pos))

    assert out.shape == (B, T, d_model)
    # Slightly looser atol than before to account for the bf16 context output.
    np.testing.assert_allclose(np.asarray(out), np.asarray(ref),
                               rtol=2e-2, atol=5e-3)
    print("KERNEL_OK")
</pallas_src>

<mosaic_0001>
module attributes {stable_mosaic.version = 11 : i64} {
  func.func @_disentangled_attn_kernel(%arg0: i32, %arg1: i32, %arg2: i32, %arg3: memref<1x8x32xbf16, #tpu.memory_space<vmem>>, %arg4: memref<1x8x32xbf16, #tpu.memory_space<vmem>>, %arg5: memref<1x8x32xbf16, #tpu.memory_space<vmem>>, %arg6: memref<16x32xbf16, #tpu.memory_space<vmem>>, %arg7: memref<16x32xbf16, #tpu.memory_space<vmem>>, %arg8: memref<1x8x32xbf16, #tpu.memory_space<vmem>>) attributes {dimension_semantics = [#tpu.dimension_semantics<parallel>, #tpu.dimension_semantics<parallel>, #tpu.dimension_semantics<parallel>], iteration_bounds = array<i64: 1, 2, 1>, scalar_prefetch = 0 : i64, scratch_operands = 0 : i64, tpu.core_type = #tpu.core_type<tc>, window_params = [{transform_indices = @transform_0, window_bounds = array<i64: 1, 8, 32>}, {transform_indices = @transform_1, window_bounds = array<i64: 1, 8, 32>}, {transform_indices = @transform_2, window_bounds = array<i64: 1, 8, 32>}, {transform_indices = @transform_3, window_bounds = array<i64: 16, 32>}, {transform_indices = @transform_4, window_bounds = array<i64: 16, 32>}, {transform_indices = @transform_5, window_bounds = array<i64: 1, 8, 32>}]} {
    %c0 = arith.constant 0 : index
    %c0_0 = arith.constant 0 : index
    %c0_1 = arith.constant 0 : index
    %0 = vector.load %arg3[%c0, %c0_0, %c0_1] : memref<1x8x32xbf16, #tpu.memory_space<vmem>>, vector<1x8x32xbf16>
    %1 = vector.shape_cast %0 : vector<1x8x32xbf16> to vector<8x32xbf16>
    %c0_2 = arith.constant 0 : index
    %c0_3 = arith.constant 0 : index
    %c0_4 = arith.constant 0 : index
    %2 = vector.load %arg4[%c0_2, %c0_3, %c0_4] : memref<1x8x32xbf16, #tpu.memory_space<vmem>>, vector<1x8x32xbf16>
    %3 = vector.shape_cast %2 : vector<1x8x32xbf16> to vector<8x32xbf16>
    %c0_5 = arith.constant 0 : index
    %c0_6 = arith.constant 0 : index
    %c0_7 = arith.constant 0 : index
    %4 = vector.load %arg5[%c0_5, %c0_6, %c0_7] : memref<1x8x32xbf16, #tpu.memory_space<vmem>>, vector<1x8x32xbf16>
    %5 = vector.shape_cast %4 : vector<1x8x32xbf16> to vector<8x32xbf16>
    %c0_8 = arith.constant 0 : index
    %c0_9 = arith.constant 0 : index
    %6 = vector.load %arg6[%c0_8, %c0_9] : memref<16x32xbf16, #tpu.memory_space<vmem>>, vector<16x32xbf16>
    %c0_10 = arith.constant 0 : index
    %c0_11 = arith.constant 0 : index
    %7 = vector.load %arg7[%c0_10, %c0_11] : memref<16x32xbf16, #tpu.memory_space<vmem>>, vector<16x32xbf16>
    %8 = tpu.iota {dimensions = array<i32: 0>} : vector<8x1xi32>
    %c7_i32 = arith.constant 7 : i32
    %9 = vector.broadcast %c7_i32 : i32 to vector<8x1xi32>
    %10 = arith.subi %9, %8 : vector<8x1xi32>
    %c0_i32 = arith.constant 0 : i32
    %11 = vector.broadcast %c0_i32 : i32 to vector<8x1xi32>
    %12 = arith.shrsi %10, %11 : vector<8x1xi32>
    %c1_i32 = arith.constant 1 : i32
    %13 = vector.broadcast %c1_i32 : i32 to vector<8x1xi32>
    %14 = arith.andi %12, %13 : vector<8x1xi32>
    %c1_i32_12 = arith.constant 1 : i32
    %15 = vector.broadcast %c1_i32_12 : i32 to vector<8x1xi32>
    %16 = arith.cmpi eq, %14, %15 : vector<8x1xi32>
    %17 = vector.shape_cast %16 : vector<8x1xi1> to vector<8x1xi1>
    %18 = vector.broadcast %17 : vector<8x1xi1> to vector<8x16xi1>
    %c1_i32_13 = arith.constant 1 : i32
    %19 = vector.broadcast %c1_i32_13 : i32 to vector<8x1xi32>
    %20 = arith.shrsi %10, %19 : vector<8x1xi32>
    %c1_i32_14 = arith.constant 1 : i32
    %21 = vector.broadcast %c1_i32_14 : i32 to vector<8x1xi32>
    %22 = arith.andi %20, %21 : vector<8x1xi32>
    %c1_i32_15 = arith.constant 1 : i32
    %23 = vector.broadcast %c1_i32_15 : i32 to vector<8x1xi32>
    %24 = arith.cmpi eq, %22, %23 : vector<8x1xi32>
    %25 = vector.shape_cast %24 : vector<8x1xi1> to vector<8x1xi1>
    %26 = vector.broadcast %25 : vector<8x1xi1> to vector<8x16xi1>
    %c2_i32 = arith.constant 2 : i32
    %27 = vector.broadcast %c2_i32 : i32 to vector<8x1xi32>
    %28 = arith.shrsi %10, %27 : vector<8x1xi32>
    %c1_i32_16 = arith.constant 1 : i32
    %29 = vector.broadcast %c1_i32_16 : i32 to vector<8x1xi32>
    %30 = arith.andi %28, %29 : vector<8x1xi32>
    %c1_i32_17 = arith.constant 1 : i32
    %31 = vector.broadcast %c1_i32_17 : i32 to vector<8x1xi32>
    %32 = arith.cmpi eq, %30, %31 : vector<8x1xi32>
    %33 = vector.shape_cast %32 : vector<8x1xi1> to vector<8x1xi1>
    %34 = vector.broadcast %33 : vector<8x1xi1> to vector<8x16xi1>
    %35 = vector.extract_strided_slice %1 {offsets = [0, 0], sizes = [8, 8], strides = [1, 1]} : vector<8x32xbf16> to vector<8x8xbf16>
    %36 = vector.extract_strided_slice %3 {offsets = [0, 0], sizes = [8, 8], strides = [1, 1]} : vector<8x32xbf16> to vector<8x8xbf16>
    %37 = vector.extract_strided_slice %5 {offsets = [0, 0], sizes = [8, 8], strides = [1, 1]} : vector<8x32xbf16> to vector<8x8xbf16>
    %38 = vector.extract_strided_slice %3 {offsets = [0, 0], sizes = [8, 8], strides = [1, 1]} : vector<8x32xbf16> to vector<8x8xbf16>
    %39 = tpu.transpose %36, [1, 0] : vector<8x8xbf16> -> vector<8x8xbf16>
    %cst = arith.constant dense<0.000000e+00> : vector<8x8xf32>
    %40 = tpu.matmul %35, %39, %cst {dimension_numbers = #tpu.dot_dimension_numbers<[1], [0], [0], [1], [0, 0, 1, 1], [], []>} : vector<8x8xbf16>, vector<8x8xbf16>, vector<8x8xf32> -> vector<8x8xf32>
    %41 = tpu.concatenate %35, %38 in 1 : vector<8x8xbf16>, vector<8x8xbf16> -> vector<8x16xbf16>
    %42 = vector.extract_strided_slice %6 {offsets = [0, 0], sizes = [16, 8], strides = [1, 1]} : vector<16x32xbf16> to vector<16x8xbf16>
    %43 = vector.extract_strided_slice %7 {offsets = [0, 0], sizes = [16, 8], strides = [1, 1]} : vector<16x32xbf16> to vector<16x8xbf16>
    %44 = tpu.concatenate %42, %43 in 1 : vector<16x8xbf16>, vector<16x8xbf16> -> vector<16x16xbf16>
    %45 = tpu.transpose %44, [1, 0] : vector<16x16xbf16> -> vector<16x16xbf16>
    %cst_18 = arith.constant dense<0.000000e+00> : vector<8x16xf32>
    %46 = tpu.matmul %41, %45, %cst_18 {dimension_numbers = #tpu.dot_dimension_numbers<[1], [0], [0], [1], [0, 0, 1, 1], [], []>} : vector<8x16xbf16>, vector<16x16xbf16>, vector<8x16xf32> -> vector<8x16xf32>
    %47 = arith.truncf %46 : vector<8x16xf32> to vector<8x16xbf16>
    %48 = vector.extract_strided_slice %47 {offsets = [0, 1], sizes = [8, 15], strides = [1, 1]} : vector<8x16xbf16> to vector<8x15xbf16>
    %49 = vector.extract_strided_slice %47 {offsets = [0, 0], sizes = [8, 1], strides = [1, 1]} : vector<8x16xbf16> to vector<8x1xbf16>
    %50 = tpu.concatenate %48, %49 in 1 : vector<8x15xbf16>, vector<8x1xbf16> -> vector<8x16xbf16>
    %51 = arith.select %18, %50, %47 : vector<8x16xi1>, vector<8x16xbf16>
    %52 = vector.extract_strided_slice %51 {offsets = [0, 2], sizes = [8, 14], strides = [1, 1]} : vector<8x16xbf16> to vector<8x14xbf16>
    %53 = vector.extract_strided_slice %51 {offsets = [0, 0], sizes = [8, 2], strides = [1, 1]} : vector<8x16xbf16> to vector<8x2xbf16>
    %54 = tpu.concatenate %52, %53 in 1 : vector<8x14xbf16>, vector<8x2xbf16> -> vector<8x16xbf16>
    %55 = arith.select %26, %54, %51 : vector<8x16xi1>, vector<8x16xbf16>
    %56 = vector.extract_strided_slice %55 {offsets = [0, 4], sizes = [8, 12], strides = [1, 1]} : vector<8x16xbf16> to vector<8x12xbf16>
    %57 = vector.extract_strided_slice %55 {offsets = [0, 0], sizes = [8, 4], strides = [1, 1]} : vector<8x16xbf16> to vector<8x4xbf16>
    %58 = tpu.concatenate %56, %57 in 1 : vector<8x12xbf16>, vector<8x4xbf16> -> vector<8x16xbf16>
    %59 = arith.select %34, %58, %55 : vector<8x16xi1>, vector<8x16xbf16>
    %60 = vector.extract_strided_slice %59 {offsets = [0, 0], sizes = [8, 8], strides = [1, 1]} : vector<8x16xbf16> to vector<8x8xbf16>
    %61 = arith.extf %60 : vector<8x8xbf16> to vector<8x8xf32>
    %62 = arith.addf %40, %61 : vector<8x8xf32>
    %cst_19 = arith.constant dense<0xFF800000> : vector<8xf32>
    %63 = vector.multi_reduction <maximumf>, %62, %cst_19 [1] : vector<8x8xf32> to vector<8xf32>
    %64 = vector.shape_cast %63 : vector<8xf32> to vector<8x1xf32>
    %65 = vector.broadcast %64 : vector<8x1xf32> to vector<8x8xf32>
    %66 = arith.subf %62, %65 : vector<8x8xf32>
    %67 = math.exp %66 : vector<8x8xf32>
    %cst_20 = arith.constant dense<0.000000e+00> : vector<8xf32>
    %68 = vector.multi_reduction <add>, %67, %cst_20 [1] : vector<8x8xf32> to vector<8xf32>
    %69 = vector.shape_cast %68 : vector<8xf32> to vector<8x1xf32>
    %70 = arith.truncf %67 : vector<8x8xf32> to vector<8x8xbf16>
    %cst_21 = arith.constant dense<0.000000e+00> : vector<8x8xf32>
    %71 = tpu.matmul %70, %37, %cst_21 {dimension_numbers = #tpu.dot_dimension_numbers<[1], [0], [0], [1], [0, 0, 1, 1], [], []>} : vector<8x8xbf16>, vector<8x8xbf16>, vector<8x8xf32> -> vector<8x8xf32>
    %72 = tpu.reciprocal %69 {approx = true} : vector<8x1xf32> -> vector<8x1xf32>
    %73 = vector.broadcast %72 : vector<8x1xf32> to vector<8x8xf32>
    %74 = arith.mulf %71, %73 : vector<8x8xf32>
    %75 = arith.truncf %74 : vector<8x8xf32> to vector<8x8xbf16>
    %c0_22 = arith.constant 0 : index
    %c0_23 = arith.constant 0 : index
    %c0_24 = arith.constant 0 : index
    %76 = vector.load %arg8[%c0_22, %c0_23, %c0_24] : memref<1x8x32xbf16, #tpu.memory_space<vmem>>, vector<1x8x8xbf16>
    %77 = vector.shape_cast %76 : vector<1x8x8xbf16> to vector<8x8xbf16>
    %78 = vector.shape_cast %75 : vector<8x8xbf16> to vector<1x8x8xbf16>
    tpu.vector_store %arg8[%c0_22, %c0_23, %c0_24], %78 {strides = array<i32>} : memref<1x8x32xbf16, #tpu.memory_space<vmem>>, vector<1x8x8xbf16>,
    %79 = vector.extract_strided_slice %1 {offsets = [0, 8], sizes = [8, 8], strides = [1, 1]} : vector<8x32xbf16> to vector<8x8xbf16>
    %80 = vector.extract_strided_slice %3 {offsets = [0, 8], sizes = [8, 8], strides = [1, 1]} : vector<8x32xbf16> to vector<8x8xbf16>
    %81 = vector.extract_strided_slice %5 {offsets = [0, 8], sizes = [8, 8], strides = [1, 1]} : vector<8x32xbf16> to vector<8x8xbf16>
    %82 = vector.extract_strided_slice %3 {offsets = [0, 8], sizes = [8, 8], strides = [1, 1]} : vector<8x32xbf16> to vector<8x8xbf16>
    %83 = tpu.transpose %80, [1, 0] : vector<8x8xbf16> -> vector<8x8xbf16>
    %cst_25 = arith.constant dense<0.000000e+00> : vector<8x8xf32>
    %84 = tpu.matmul %79, %83, %cst_25 {dimension_numbers = #tpu.dot_dimension_numbers<[1], [0], [0], [1], [0, 0, 1, 1], [], []>} : vector<8x8xbf16>, vector<8x8xbf16>, vector<8x8xf32> -> vector<8x8xf32>
    %85 = tpu.concatenate %79, %82 in 1 : vector<8x8xbf16>, vector<8x8xbf16> -> vector<8x16xbf16>
    %86 = vector.extract_strided_slice %6 {offsets = [0, 8], sizes = [16, 8], strides = [1, 1]} : vector<16x32xbf16> to vector<16x8xbf16>
    %87 = vector.extract_strided_slice %7 {offsets = [0, 8], sizes = [16, 8], strides = [1, 1]} : vector<16x32xbf16> to vector<16x8xbf16>
    %88 = tpu.concatenate %86, %87 in 1 : vector<16x8xbf16>, vector<16x8xbf16> -> vector<16x16xbf16>
    %89 = tpu.transpose %88, [1, 0] : vector<16x16xbf16> -> vector<16x16xbf16>
    %cst_26 = arith.constant dense<0.000000e+00> : vector<8x16xf32>
    %90 = tpu.matmul %85, %89, %cst_26 {dimension_numbers = #tpu.dot_dimension_numbers<[1], [0], [0], [1], [0, 0, 1, 1], [], []>} : vector<8x16xbf16>, vector<16x16xbf16>, vector<8x16xf32> -> vector<8x16xf32>
    %91 = arith.truncf %90 : vector<8x16xf32> to vector<8x16xbf16>
    %92 = vector.extract_strided_slice %91 {offsets = [0, 1], sizes = [8, 15], strides = [1, 1]} : vector<8x16xbf16> to vector<8x15xbf16>
    %93 = vector.extract_strided_slice %91 {offsets = [0, 0], sizes = [8, 1], strides = [1, 1]} : vector<8x16xbf16> to vector<8x1xbf16>
    %94 = tpu.concatenate %92, %93 in 1 : vector<8x15xbf16>, vector<8x1xbf16> -> vector<8x16xbf16>
    %95 = arith.select %18, %94, %91 : vector<8x16xi1>, vector<8x16xbf16>
    %96 = vector.extract_strided_slice %95 {offsets = [0, 2], sizes = [8, 14], strides = [1, 1]} : vector<8x16xbf16> to vector<8x14xbf16>
    %97 = vector.extract_strided_slice %95 {offsets = [0, 0], sizes = [8, 2], strides = [1, 1]} : vector<8x16xbf16> to vector<8x2xbf16>
    %98 = tpu.concatenate %96, %97 in 1 : vector<8x14xbf16>, vector<8x2xbf16> -> vector<8x16xbf16>
    %99 = arith.select %26, %98, %95 : vector<8x16xi1>, vector<8x16xbf16>
    %100 = vector.extract_strided_slice %99 {offsets = [0, 4], sizes = [8, 12], strides = [1, 1]} : vector<8x16xbf16> to vector<8x12xbf16>
    %101 = vector.extract_strided_slice %99 {offsets = [0, 0], sizes = [8, 4], strides = [1, 1]} : vector<8x16xbf16> to vector<8x4xbf16>
    %102 = tpu.concatenate %100, %101 in 1 : vector<8x12xbf16>, vector<8x4xbf16> -> vector<8x16xbf16>
    %103 = arith.select %34, %102, %99 : vector<8x16xi1>, vector<8x16xbf16>
    %104 = vector.extract_strided_slice %103 {offsets = [0, 0], sizes = [8, 8], strides = [1, 1]} : vector<8x16xbf16> to vector<8x8xbf16>
    %105 = arith.extf %104 : vector<8x8xbf16> to vector<8x8xf32>
    %106 = arith.addf %84, %105 : vector<8x8xf32>
    %cst_27 = arith.constant dense<0xFF800000> : vector<8xf32>
    %107 = vector.multi_reduction <maximumf>, %106, %cst_27 [1] : vector<8x8xf32> to vector<8xf32>
    %108 = vector.shape_cast %107 : vector<8xf32> to vector<8x1xf32>
    %109 = vector.broadcast %108 : vector<8x1xf32> to vector<8x8xf32>
    %110 = arith.subf %106, %109 : vector<8x8xf32>
    %111 = math.exp %110 : vector<8x8xf32>
    %cst_28 = arith.constant dense<0.000000e+00> : vector<8xf32>
    %112 = vector.multi_reduction <add>, %111, %cst_28 [1] : vector<8x8xf32> to vector<8xf32>
    %113 = vector.shape_cast %112 : vector<8xf32> to vector<8x1xf32>
    %114 = arith.truncf %111 : vector<8x8xf32> to vector<8x8xbf16>
    %cst_29 = arith.constant dense<0.000000e+00> : vector<8x8xf32>
    %115 = tpu.matmul %114, %81, %cst_29 {dimension_numbers = #tpu.dot_dimension_numbers<[1], [0], [0], [1], [0, 0, 1, 1], [], []>} : vector<8x8xbf16>, vector<8x8xbf16>, vector<8x8xf32> -> vector<8x8xf32>
    %116 = tpu.reciprocal %113 {approx = true} : vector<8x1xf32> -> vector<8x1xf32>
    %117 = vector.broadcast %116 : vector<8x1xf32> to vector<8x8xf32>
    %118 = arith.mulf %115, %117 : vector<8x8xf32>
    %119 = arith.truncf %118 : vector<8x8xf32> to vector<8x8xbf16>
    %c0_30 = arith.constant 0 : index
    %c0_31 = arith.constant 0 : index
    %c8 = arith.constant 8 : index
    %120 = vector.load %arg8[%c0_30, %c0_31, %c8] : memref<1x8x32xbf16, #tpu.memory_space<vmem>>, vector<1x8x8xbf16>
    %121 = vector.shape_cast %120 : vector<1x8x8xbf16> to vector<8x8xbf16>
    %122 = vector.shape_cast %119 : vector<8x8xbf16> to vector<1x8x8xbf16>
    tpu.vector_store %arg8[%c0_30, %c0_31, %c8], %122 {strides = array<i32>} : memref<1x8x32xbf16, #tpu.memory_space<vmem>>, vector<1x8x8xbf16>,
    %123 = vector.extract_strided_slice %1 {offsets = [0, 16], sizes = [8, 8], strides = [1, 1]} : vector<8x32xbf16> to vector<8x8xbf16>
    %124 = vector.extract_strided_slice %3 {offsets = [0, 16], sizes = [8, 8], strides = [1, 1]} : vector<8x32xbf16> to vector<8x8xbf16>
    %125 = vector.extract_strided_slice %5 {offsets = [0, 16], sizes = [8, 8], strides = [1, 1]} : vector<8x32xbf16> to vector<8x8xbf16>
    %126 = vector.extract_strided_slice %3 {offsets = [0, 16], sizes = [8, 8], strides = [1, 1]} : vector<8x32xbf16> to vector<8x8xbf16>
    %127 = tpu.transpose %124, [1, 0] : vector<8x8xbf16> -> vector<8x8xbf16>
    %cst_32 = arith.constant dense<0.000000e+00> : vector<8x8xf32>
    %128 = tpu.matmul %123, %127, %cst_32 {dimension_numbers = #tpu.dot_dimension_numbers<[1], [0], [0], [1], [0, 0, 1, 1], [], []>} : vector<8x8xbf16>, vector<8x8xbf16>, vector<8x8xf32> -> vector<8x8xf32>
    %129 = tpu.concatenate %123, %126 in 1 : vector<8x8xbf16>, vector<8x8xbf16> -> vector<8x16xbf16>
    %130 = vector.extract_strided_slice %6 {offsets = [0, 16], sizes = [16, 8], strides = [1, 1]} : vector<16x32xbf16> to vector<16x8xbf16>
    %131 = vector.extract_strided_slice %7 {offsets = [0, 16], sizes = [16, 8], strides = [1, 1]} : vector<16x32xbf16> to vector<16x8xbf16>
    %132 = tpu.concatenate %130, %131 in 1 : vector<16x8xbf16>, vector<16x8xbf16> -> vector<16x16xbf16>
    %133 = tpu.transpose %132, [1, 0] : vector<16x16xbf16> -> vector<16x16xbf16>
    %cst_33 = arith.constant dense<0.000000e+00> : vector<8x16xf32>
    %134 = tpu.matmul %129, %133, %cst_33 {dimension_numbers = #tpu.dot_dimension_numbers<[1], [0], [0], [1], [0, 0, 1, 1], [], []>} : vector<8x16xbf16>, vector<16x16xbf16>, vector<8x16xf32> -> vector<8x16xf32>
    %135 = arith.truncf %134 : vector<8x16xf32> to vector<8x16xbf16>
    %136 = vector.extract_strided_slice %135 {offsets = [0, 1], sizes = [8, 15], strides = [1, 1]} : vector<8x16xbf16> to vector<8x15xbf16>
    %137 = vector.extract_strided_slice %135 {offsets = [0, 0], sizes = [8, 1], strides = [1, 1]} : vector<8x16xbf16> to vector<8x1xbf16>
    %138 = tpu.concatenate %136, %137 in 1 : vector<8x15xbf16>, vector<8x1xbf16> -> vector<8x16xbf16>
    %139 = arith.select %18, %138, %135 : vector<8x16xi1>, vector<8x16xbf16>
    %140 = vector.extract_strided_slice %139 {offsets = [0, 2], sizes = [8, 14], strides = [1, 1]} : vector<8x16xbf16> to vector<8x14xbf16>
    %141 = vector.extract_strided_slice %139 {offsets = [0, 0], sizes = [8, 2], strides = [1, 1]} : vector<8x16xbf16> to vector<8x2xbf16>
    %142 = tpu.concatenate %140, %141 in 1 : vector<8x14xbf16>, vector<8x2xbf16> -> vector<8x16xbf16>
    %143 = arith.select %26, %142, %139 : vector<8x16xi1>, vector<8x16xbf16>
    %144 = vector.extract_strided_slice %143 {offsets = [0, 4], sizes = [8, 12], strides = [1, 1]} : vector<8x16xbf16> to vector<8x12xbf16>
    %145 = vector.extract_strided_slice %143 {offsets = [0, 0], sizes = [8, 4], strides = [1, 1]} : vector<8x16xbf16> to vector<8x4xbf16>
    %146 = tpu.concatenate %144, %145 in 1 : vector<8x12xbf16>, vector<8x4xbf16> -> vector<8x16xbf16>
    %147 = arith.select %34, %146, %143 : vector<8x16xi1>, vector<8x16xbf16>
    %148 = vector.extract_strided_slice %147 {offsets = [0, 0], sizes = [8, 8], strides = [1, 1]} : vector<8x16xbf16> to vector<8x8xbf16>
    %149 = arith.extf %148 : vector<8x8xbf16> to vector<8x8xf32>
    %150 = arith.addf %128, %149 : vector<8x8xf32>
    %cst_34 = arith.constant dense<0xFF800000> : vector<8xf32>
    %151 = vector.multi_reduction <maximumf>, %150, %cst_34 [1] : vector<8x8xf32> to vector<8xf32>
    %152 = vector.shape_cast %151 : vector<8xf32> to vector<8x1xf32>
    %153 = vector.broadcast %152 : vector<8x1xf32> to vector<8x8xf32>
    %154 = arith.subf %150, %153 : vector<8x8xf32>
    %155 = math.exp %154 : vector<8x8xf32>
    %cst_35 = arith.constant dense<0.000000e+00> : vector<8xf32>
    %156 = vector.multi_reduction <add>, %155, %cst_35 [1] : vector<8x8xf32> to vector<8xf32>
    %157 = vector.shape_cast %156 : vector<8xf32> to vector<8x1xf32>
    %158 = arith.truncf %155 : vector<8x8xf32> to vector<8x8xbf16>
    %cst_36 = arith.constant dense<0.000000e+00> : vector<8x8xf32>
    %159 = tpu.matmul %158, %125, %cst_36 {dimension_numbers = #tpu.dot_dimension_numbers<[1], [0], [0], [1], [0, 0, 1, 1], [], []>} : vector<8x8xbf16>, vector<8x8xbf16>, vector<8x8xf32> -> vector<8x8xf32>
    %160 = tpu.reciprocal %157 {approx = true} : vector<8x1xf32> -> vector<8x1xf32>
    %161 = vector.broadcast %160 : vector<8x1xf32> to vector<8x8xf32>
    %162 = arith.mulf %159, %161 : vector<8x8xf32>
    %163 = arith.truncf %162 : vector<8x8xf32> to vector<8x8xbf16>
    %c0_37 = arith.constant 0 : index
    %c0_38 = arith.constant 0 : index
    %c16 = arith.constant 16 : index
    %164 = vector.load %arg8[%c0_37, %c0_38, %c16] : memref<1x8x32xbf16, #tpu.memory_space<vmem>>, vector<1x8x8xbf16>
    %165 = vector.shape_cast %164 : vector<1x8x8xbf16> to vector<8x8xbf16>
    %166 = vector.shape_cast %163 : vector<8x8xbf16> to vector<1x8x8xbf16>
    tpu.vector_store %arg8[%c0_37, %c0_38, %c16], %166 {strides = array<i32>} : memref<1x8x32xbf16, #tpu.memory_space<vmem>>, vector<1x8x8xbf16>,
    %167 = vector.extract_strided_slice %1 {offsets = [0, 24], sizes = [8, 8], strides = [1, 1]} : vector<8x32xbf16> to vector<8x8xbf16>
    %168 = vector.extract_strided_slice %3 {offsets = [0, 24], sizes = [8, 8], strides = [1, 1]} : vector<8x32xbf16> to vector<8x8xbf16>
    %169 = vector.extract_strided_slice %5 {offsets = [0, 24], sizes = [8, 8], strides = [1, 1]} : vector<8x32xbf16> to vector<8x8xbf16>
    %170 = vector.extract_strided_slice %3 {offsets = [0, 24], sizes = [8, 8], strides = [1, 1]} : vector<8x32xbf16> to vector<8x8xbf16>
    %171 = tpu.transpose %168, [1, 0] : vector<8x8xbf16> -> vector<8x8xbf16>
    %cst_39 = arith.constant dense<0.000000e+00> : vector<8x8xf32>
    %172 = tpu.matmul %167, %171, %cst_39 {dimension_numbers = #tpu.dot_dimension_numbers<[1], [0], [0], [1], [0, 0, 1, 1], [], []>} : vector<8x8xbf16>, vector<8x8xbf16>, vector<8x8xf32> -> vector<8x8xf32>
    %173 = tpu.concatenate %167, %170 in 1 : vector<8x8xbf16>, vector<8x8xbf16> -> vector<8x16xbf16>
    %174 = vector.extract_strided_slice %6 {offsets = [0, 24], sizes = [16, 8], strides = [1, 1]} : vector<16x32xbf16> to vector<16x8xbf16>
    %175 = vector.extract_strided_slice %7 {offsets = [0, 24], sizes = [16, 8], strides = [1, 1]} : vector<16x32xbf16> to vector<16x8xbf16>
    %176 = tpu.concatenate %174, %175 in 1 : vector<16x8xbf16>, vector<16x8xbf16> -> vector<16x16xbf16>
    %177 = tpu.transpose %176, [1, 0] : vector<16x16xbf16> -> vector<16x16xbf16>
    %cst_40 = arith.constant dense<0.000000e+00> : vector<8x16xf32>
    %178 = tpu.matmul %173, %177, %cst_40 {dimension_numbers = #tpu.dot_dimension_numbers<[1], [0], [0], [1], [0, 0, 1, 1], [], []>} : vector<8x16xbf16>, vector<16x16xbf16>, vector<8x16xf32> -> vector<8x16xf32>
    %179 = arith.truncf %178 : vector<8x16xf32> to vector<8x16xbf16>
    %180 = vector.extract_strided_slice %179 {offsets = [0, 1], sizes = [8, 15], strides = [1, 1]} : vector<8x16xbf16> to vector<8x15xbf16>
    %181 = vector.extract_strided_slice %179 {offsets = [0, 0], sizes = [8, 1], strides = [1, 1]} : vector<8x16xbf16> to vector<8x1xbf16>
    %182 = tpu.concatenate %180, %181 in 1 : vector<8x15xbf16>, vector<8x1xbf16> -> vector<8x16xbf16>
    %183 = arith.select %18, %182, %179 : vector<8x16xi1>, vector<8x16xbf16>
    %184 = vector.extract_strided_slice %183 {offsets = [0, 2], sizes = [8, 14], strides = [1, 1]} : vector<8x16xbf16> to vector<8x14xbf16>
    %185 = vector.extract_strided_slice %183 {offsets = [0, 0], sizes = [8, 2], strides = [1, 1]} : vector<8x16xbf16> to vector<8x2xbf16>
    %186 = tpu.concatenate %184, %185 in 1 : vector<8x14xbf16>, vector<8x2xbf16> -> vector<8x16xbf16>
    %187 = arith.select %26, %186, %183 : vector<8x16xi1>, vector<8x16xbf16>
    %188 = vector.extract_strided_slice %187 {offsets = [0, 4], sizes = [8, 12], strides = [1, 1]} : vector<8x16xbf16> to vector<8x12xbf16>
    %189 = vector.extract_strided_slice %187 {offsets = [0, 0], sizes = [8, 4], strides = [1, 1]} : vector<8x16xbf16> to vector<8x4xbf16>
    %190 = tpu.concatenate %188, %189 in 1 : vector<8x12xbf16>, vector<8x4xbf16> -> vector<8x16xbf16>
    %191 = arith.select %34, %190, %187 : vector<8x16xi1>, vector<8x16xbf16>
    %192 = vector.extract_strided_slice %191 {offsets = [0, 0], sizes = [8, 8], strides = [1, 1]} : vector<8x16xbf16> to vector<8x8xbf16>
    %193 = arith.extf %192 : vector<8x8xbf16> to vector<8x8xf32>
    %194 = arith.addf %172, %193 : vector<8x8xf32>
    %cst_41 = arith.constant dense<0xFF800000> : vector<8xf32>
    %195 = vector.multi_reduction <maximumf>, %194, %cst_41 [1] : vector<8x8xf32> to vector<8xf32>
    %196 = vector.shape_cast %195 : vector<8xf32> to vector<8x1xf32>
    %197 = vector.broadcast %196 : vector<8x1xf32> to vector<8x8xf32>
    %198 = arith.subf %194, %197 : vector<8x8xf32>
    %199 = math.exp %198 : vector<8x8xf32>
    %cst_42 = arith.constant dense<0.000000e+00> : vector<8xf32>
    %200 = vector.multi_reduction <add>, %199, %cst_42 [1] : vector<8x8xf32> to vector<8xf32>
    %201 = vector.shape_cast %200 : vector<8xf32> to vector<8x1xf32>
    %202 = arith.truncf %199 : vector<8x8xf32> to vector<8x8xbf16>
    %cst_43 = arith.constant dense<0.000000e+00> : vector<8x8xf32>
    %203 = tpu.matmul %202, %169, %cst_43 {dimension_numbers = #tpu.dot_dimension_numbers<[1], [0], [0], [1], [0, 0, 1, 1], [], []>} : vector<8x8xbf16>, vector<8x8xbf16>, vector<8x8xf32> -> vector<8x8xf32>
    %204 = tpu.reciprocal %201 {approx = true} : vector<8x1xf32> -> vector<8x1xf32>
    %205 = vector.broadcast %204 : vector<8x1xf32> to vector<8x8xf32>
    %206 = arith.mulf %203, %205 : vector<8x8xf32>
    %207 = arith.truncf %206 : vector<8x8xf32> to vector<8x8xbf16>
    %c0_44 = arith.constant 0 : index
    %c0_45 = arith.constant 0 : index
    %c24 = arith.constant 24 : index
    %208 = vector.load %arg8[%c0_44, %c0_45, %c24] : memref<1x8x32xbf16, #tpu.memory_space<vmem>>, vector<1x8x8xbf16>
    %209 = vector.shape_cast %208 : vector<1x8x8xbf16> to vector<8x8xbf16>
    %210 = vector.shape_cast %207 : vector<8x8xbf16> to vector<1x8x8xbf16>
    tpu.vector_store %arg8[%c0_44, %c0_45, %c24], %210 {strides = array<i32>} : memref<1x8x32xbf16, #tpu.memory_space<vmem>>, vector<1x8x8xbf16>,
    return
  }
  func.func @transform_0(%arg0: i32, %arg1: i32, %arg2: i32) -> (i32, i32, i32) {
    %c0_i32 = arith.constant 0 : i32
    return %arg1, %arg2, %arg0 : i32, i32, i32
  }
  func.func @transform_1(%arg0: i32, %arg1: i32, %arg2: i32) -> (i32, i32, i32) {
    %c0_i32 = arith.constant 0 : i32
    %c0_i32_0 = arith.constant 0 : i32
    return %arg1, %c0_i32, %arg0 : i32, i32, i32
  }
  func.func @transform_2(%arg0: i32, %arg1: i32, %arg2: i32) -> (i32, i32, i32) {
    %c0_i32 = arith.constant 0 : i32
    %c0_i32_0 = arith.constant 0 : i32
    return %arg1, %c0_i32, %arg0 : i32, i32, i32
  }
  func.func @transform_3(%arg0: i32, %arg1: i32, %arg2: i32) -> (i32, i32) {
    %c0_i32 = arith.constant 0 : i32
    %c0_i32_0 = arith.constant 0 : i32
    return %c0_i32, %arg0 : i32, i32
  }
  func.func @transform_4(%arg0: i32, %arg1: i32, %arg2: i32) -> (i32, i32) {
    %c0_i32 = arith.constant 0 : i32
    %c0_i32_0 = arith.constant 0 : i32
    return %c0_i32, %arg0 : i32, i32
  }
  func.func @transform_5(%arg0: i32, %arg1: i32, %arg2: i32) -> (i32, i32, i32) {
    %c0_i32 = arith.constant 0 : i32
    return %arg1, %arg2, %arg0 : i32, i32, i32
  }
}

</mosaic_0001>

<bundles_post_ra>
// kernel: disentangled_self_attention_forward.1
= control target key start
LH: loop header
LB: loop body
LE: loop exit
PB: predicated region body
PF: predicated region fallthrough
CT: control target
= control target key end

     0   :  { %s1629_s18 = smov 0   ;;  %s1631_s19 = smov 0   ;;  %s1892_s0 = inlined_call_operand.vmem [shape: bf16[2,8,32], index: 0, kind: input, shape index: {}]   ;;  %s1893_s1 = inlined_call_operand.vmem [shape: bf16[2,8,32], index: 1, kind: input, shape index: {}]   ;;  %s1894_s2 = inlined_call_operand.vmem [shape: bf16[2,8,32], index: 2, kind: input, shape index: {}]   ;;  %s1895_s3 = inlined_call_operand.vmem [shape: bf16[16,32], index: 3, kind: input, shape index: {}]   ;;  %s1896_s4 = inlined_call_operand.vmem [shape: bf16[16,32], index: 4, kind: input, shape index: {}]   ;;  %s1897_s5 = inlined_call_operand.vmem [shape: bf16[2,8,32], index: 5, kind: output, shape index: {}]  }
   0x1   :  { %s1633_s20 = smov 0  }
   0x2 LB: > { %s30_s21 = sadd.s32 1, %s1579_s19  ;;  %p1376_p0 = scmp.ge.s32.totalorder %s1583_s20, 1  ;;  %s1583_s20 = sphi %s1633_s20, %s15_s20   ;;  %s1579_s19 = sphi %s1631_s19, %s1905_s19   ;;  %s1575_s18 = sphi %s1629_s18, %s1904_s18  }
   0x3   : > { %p32_p1 = scmp.ge.s32.totalorder %s30_s21, 2  ;;  %p265_p2 = scmp.lt.s32.totalorder %s1583_s20, 3 }
   0x5   : > { %s1907_s21 = smov (%p32_p1, %s30_s21), 0  ;;  %p266_p3 = pnand %p1376_p0, %p265_p2 }
   0x6   : > { %v1650_v0 = vld [vmem:[%s1896_s4] sm:$0xff] (!%p266_p3)   ;;  %p325_p4 = scmp.lt.s32.totalorder (!%p266_p3), %s1575_s18, 1  ;;  %s1585_s24 = smov (!%p266_p3), 8   ;;  %v1586_v1 = vmov (!%p266_p3), 0.0   ;;  %vm1587_vm0 = vmmov (!%p266_p3), 0   ;;  %vm397_vm1 = vcmask (!%p266_p3), 64512   ;;  %v375_v21 = vlaneseq (!%p266_p3) }
   0x7   : > { %269 = sbr.rel (%p266_p3) target bundleno = 2347 (0x92b), region = 40  ;;  %411 = vrot.lane.b32.xlu0 (!%p266_p3), %v1650_v0, %s1585_s24  ;;  %1430 = vmatprep.subr.bf16.mxu0 (!%p266_p3), %v1586_v1  ;;  %v1673_v4 = vld [vmem:[%s1895_s3] sm:$0xff] (!%p266_p3)   ;;  %vm416_vm2 = vcmask (!%p266_p3), 130048   ;;  %s1588_s9 = smov (!%p266_p3), 120   ;;  %vm467_vm4 = vcmask (!%p266_p3), 121856   ;;  %vm479_vm7 = vcmask (!%p266_p3), 113664  }
   0x8   : > { %1432 = vmatprep.mubr.msk.bf16.mxu0 (!%p266_p3), %vm1587_vm0, %v1586_v1  ;;  %1436 = vmatprep.subr.bf16.mxu1 (!%p266_p3), %v1586_v1  ;;  %s1589_s10 = smov (!%p266_p3), 127   ;;  %s1590_s11 = smov (!%p266_p3), 15   ;;  %v376_v22 = vshrl.u32 (!%p266_p3), %v375_v21, 7  ;;  %vm491_vm10 = vcmask (!%p266_p3), 97280   ;;  %vm557_vm12 = vcmask (!%p266_p3), 1043456   ;;  %vm604_vm13 = vcmask (!%p266_p3), 60416  }
   0x9   : > { %1438 = vmatprep.mubr.msk.bf16.mxu1 (!%p266_p3), %vm1587_vm0, %v1586_v1  ;;  %s1591_s12 = smov (!%p266_p3), 14   ;;  %s1592_s13 = smov (!%p266_p3), 126   ;;  %vm811_vm14 = vcmask (!%p266_p3), 126016   ;;  %vm1014_vm15 = vcmask (!%p266_p3), 191616  }
   0xa   : > { %v377_v23 = vsub.s32 (!%p266_p3), 7, %v376_v22  ;;  %s1593_s14 = smov (!%p266_p3), 12   ;;  %s1594_s15 = smov (!%p266_p3), 124  }
   0xb   : > { %s1595_s16 = smov (!%p266_p3), 112   ;;  %s1596_s23 = smov (!%p266_p3), 104  }
   0xc   : > { %v378_v24 = vand.u32 (!%p266_p3), 1, %v377_v23  ;;  %v382_v36 = vshra.s32 (!%p266_p3), %v377_v23, 1  ;;  %v387_v48 = vshra.s32 (!%p266_p3), %v377_v23, 2  ;;  %s1597_s26 = smov (!%p266_p3), 16  }
   0xe   : > { %s1909_s18 = smov (!%p325_p4, %s1575_s18), 1  ;;  %vm379_vm3 = vcmp.eq.s32.totalorder %v378_v24, 1  ;;  %v383_v37 = vand.u32 1, %v382_v36  ;;  %v388_v49 = vand.u32 1, %v387_v48 }
   0xf   : > { %s1660_s25 = sshll.u32 %s1909_s18, 2  ;;  %vm1704_vm5 = vmpackc.low %vm379_vm3, %vm379_vm3 }
  0x10   : > { %s341_s28 = scalar_lea.vmem %s1893_s1, %s1660_s25  ;;  %s334_s8 = scalar_lea.vmem %s1892_s0, %s1660_s25  ;;  %vm384_vm6 = vcmp.eq.s32.totalorder %v383_v37, 1  ;;  %vm389_vm9 = vcmp.eq.s32.totalorder %v388_v49, 1 }
  0x11   : > { %v369_v2 = vld [vmem:[%s341_s28] sm:$0xf]  ;;  %vm1720_vm8 = vmpackc.low %vm384_vm6, %vm384_vm6  ;;  %s348_s22 = scalar_lea.vmem %s1894_s2, %s1660_s25  ;;  %s366_s29 = scalar_lea.vmem %s1897_s5, %s1660_s25 }
  0x12   : > { %v1666_v3 = vcombine.low %v369_v2, %v369_v2  ;;  %v368_v8 = vld [vmem:[%s334_s8] sm:$0xf]  ;;  %v502_v11 = vsel %vm397_vm1, %v369_v2, 0  ;;  %vm1737_vm11 = vmpackc.low %vm389_vm9, %vm389_vm9 }
  0x13   : > { %1437 = vmatpush3.bf16.xpose.msra.mxu1 %v502_v11  ;;  %v1700_v20 = vcombine.low %v368_v8, %v368_v8  ;;  %v370_v58 = vld [vmem:[%s348_s22] sm:$0xf] }
  0x14   : > { %395 = vrot.lane.b32.xlu0 %v1666_v3, %s1585_s24  ;;  %1448 = vmatprep.subr.bf16.mxu1 %v1586_v1  ;;  %v559_v59 = vsel %vm557_vm12, %v370_v58, 0  ;;  %v1786_v22 = vcombine.low %v370_v58, %v370_v58 }
  0x18   : > { %613 = vrot.lane.b32.xlu0 %v1673_v4, %s1588_s9 }
  0x1a   : > { %1439 = vmatmul.mubr.msk.bf16.vlgmr.msra.gmra.mrb[0].mxu1 %vm397_vm1, %v368_v8 }
  0x1b   : > { %1450 = vmatprep.mubr.msk.bf16.mxu1 %vm1587_vm0, %v1586_v1 }
  0x79   : > { %v412_v5 = vpop.permute.xlu0 %411 }
  0x7a   : > { %v415_v6 = vsel %vm397_vm1, %v1673_v4, %v412_v5 }
  0x7b   : > { %v419_v7 = vsel %vm416_vm2, %v415_v6, 0 }
  0x7c   : > { %1431 = vmatpush3.bf16.xpose.msra.mxu0 %v419_v7 }
  0x7d   : > { %1442 = vmatprep.subr.bf16.mxu0 %v1586_v1 }
  0x86   : > { %v396_v9 = vpop.permute.xlu0 %395 }
  0x87   : > { %v400_v10 = vsel %vm397_vm1, %v368_v8, %v396_v9 }
  0x88   : > { %1433 = vmatmul.mubr.msk.bf16.vlgmr.msra.gmra.mrb[0].mxu0 %vm416_vm2, %v400_v10 }
  0x89   : > { %1444 = vmatprep.mubr.msk.bf16.mxu0 %vm1587_vm0, %v1586_v1  ;;  %1443 = vmatpush3.bf16.msra.mxu0 %v559_v59 }
  0x8a   : > { %v614_v12 = vpop.permute.xlu0 %613  ;;  %1454 = vmatprep.subr.bf16.mxu0 %v1586_v1 }
  0x8b   : > { %v617_v13 = vsel %vm397_vm1, %v614_v12, %v1650_v0 }
  0x8c   : > { %v620_v14 = vsel %vm416_vm2, %v617_v13, 0 }
  0x8d   : > { %1449 = vmatpush3.bf16.xpose.msra.mxu1 %v620_v14 }
  0x8e   : > { %1460 = vmatprep.subr.bf16.mxu1 %v1586_v1 }
  0xed   : > { %v538_v25 = vpop.f32.mrb[0].mxu1 }
  0xee   : > { %v1440_v26 = vpop.f32.mrb[1].mxu1 }
  0xef   : > { %v541_v27 = vpop.f32.mrb[2].mxu1 }
  0xf0   : > { %v1441_v28 = vpop.f32.mrb[3].mxu1 }
 0x15b   : > { %v455_v15 = vpop.f32.mrb[0].mxu0 }
 0x15c   : > { %v461_v16 = vpack.c.bf16 %v455_v15, %v455_v15  ;;  %v1434_v17 = vpop.f32.mrb[1].mxu0 }
 0x15d   : > { %v458_v18 = vpop.f32.mrb[2].mxu0 }
 0x15e   : > { %463 = vrot.lane.b32.xlu1 %v461_v16, %s1589_s10  ;;  %v1435_v19 = vpop.f32.mrb[3].mxu0 }
 0x162   : > { %465 = vrot.lane.b32.xlu1 %v461_v16, %s1590_s11 }
 0x166   : > { %609 = vrot.lane.b32.xlu1 %v1700_v20, %s1588_s9 }
 0x1d0   : > { %v464_v29 = vpop.permute.xlu1 %463 }
 0x1d4   : > { %v466_v31 = vpop.permute.xlu1 %465 }
 0x1d5   : > { %v470_v32 = vsel %vm467_vm4, %v464_v29, %v466_v31 }
 0x1d6   : > { %v473_v33 = vsel %vm1704_vm5, %v470_v32, %v461_v16 }
 0x1d7   : > { %477 = vrot.lane.b32.xlu1 %v473_v33, %s1591_s12  ;;  %475 = vrot.lane.b32.xlu0 %v473_v33, %s1592_s13 }
 0x1d8   : > { %v1713_v34 = vpop.permute.xlu1 %609 }
 0x1d9   : > { %v612_v35 = vsel %vm397_vm1, %v1713_v34, %v369_v2 }
 0x1da   : > { %1451 = vmatmul.mubr.msk.bf16.vlgmr.msra.gmra.mrb[4].mxu1 %vm416_vm2, %v612_v35 }
 0x1db   : > { %1462 = vmatprep.mubr.msk.bf16.mxu1 %vm1587_vm0, %v1586_v1 }
 0x249   : > { %v476_v39 = vpop.permute.xlu0 %475  ;;  %v478_v40 = vpop.permute.xlu1 %477 }
 0x24a   : > { %v482_v41 = vsel %vm479_vm7, %v476_v39, %v478_v40 }
 0x24b   : > { %v485_v42 = vsel %vm1720_vm8, %v482_v41, %v473_v33 }
 0x24c   : > { %489 = vrot.lane.b32.xlu1 %v485_v42, %s1593_s14  ;;  %487 = vrot.lane.b32.xlu0 %v485_v42, %s1594_s15 }
 0x250   : > { %694 = vrot.lane.b32.xlu1 %v1666_v3, %s1588_s9 }
 0x2ad   : > { %v656_v43 = vpop.f32.mrb[4].mxu1 }
 0x2ae   : > { %v662_v44 = vpack.c.bf16 %v656_v43, %v656_v43  ;;  %v1452_v45 = vpop.f32.mrb[5].mxu1 }
 0x2af   : > { %v659_v46 = vpop.f32.mrb[6].mxu1 }
 0x2b0   : > { %664 = vrot.lane.b32.xlu1 %v662_v44, %s1589_s10  ;;  %v1453_v47 = vpop.f32.mrb[7].mxu1 }
 0x2b4   : > { %666 = vrot.lane.b32.xlu1 %v662_v44, %s1590_s11 }
 0x2b8   : > { %817 = vrot.lane.b32.xlu1 %v1673_v4, %s1595_s16 }
 0x2bc   : > { %819 = vrot.lane.b32.xlu1 %v1650_v0, %s1588_s9 }
 0x2be   : > { %v490_v51 = vpop.permute.xlu1 %489  ;;  %v488_v52 = vpop.permute.xlu0 %487 }
 0x2bf   : > { %v494_v53 = vsel %vm491_vm10, %v488_v52, %v490_v51 }
 0x2c0   : > { %v497_v54 = vsel %vm1737_vm11, %v494_v53, %v485_v42  ;;  %813 = vrot.lane.b32.xlu1 %v1700_v20, %s1595_s16 }
 0x2c1   : > { %v498_v55 = vunpack.c.l.bf16 %v497_v54 }
 0x2c2   : > { %v695_v60 = vpop.permute.xlu1 %694 }
 0x2c3   : > { %v539_v56 = vadd.f32 %v538_v25, %v498_v55  ;;  %v699_v11 = vsel %vm397_vm1, %v695_v60, 0 }
 0x2c5   : > { %v544_v57 = vsel %vm397_vm1, %v539_v56, -inf }
 0x2c6   : > { %545 = vmax.xlane.f32.xlu0 %v544_v57 }
 0x322   : > { %v665_v61 = vpop.permute.xlu1 %664 }
 0x326   : > { %v667_v62 = vpop.permute.xlu1 %666 }
 0x327   : > { %v670_v63 = vsel %vm467_vm4, %v665_v61, %v667_v62 }
 0x328   : > { %v672_v2 = vsel %vm1704_vm5, %v670_v63, %v662_v44 }
 0x329   : > { %674 = vrot.lane.b32.xlu1 %v672_v2, %s1592_s13 }
 0x32a   : > { %v818_v8 = vpop.permute.xlu1 %817 }
 0x32d   : > { %676 = vrot.lane.b32.xlu1 %v672_v2, %s1591_s12 }
 0x32e   : > { %v820_v12 = vpop.permute.xlu1 %819 }
 0x32f   : > { %v823_v13 = vsel %vm397_vm1, %v818_v8, %v820_v12 }
 0x330   : > { %v826_v14 = vsel %vm416_vm2, %v823_v13, 0 }
 0x332   : > { %v1774_v15 = vpop.permute.xlu1 %813 }
 0x333   : > { %v816_v16 = vsel %vm397_vm1, %v1774_v15, %v695_v60 }
 0x353   : > { %v546_v5 = vpop.xlane.xlu0 %545 }
 0x354   : > { %v547_v6 = vsub.f32 %v539_v56, %v546_v5 }
 0x356   : > { %v548_v7 = vmul.f32 1.442695, %v547_v6 }
 0x358   : > { %1545 = vpow2.f32 %v548_v7 }
 0x362   : > { %v1758_v9 = vpop.eup %1545 }
 0x363   : > { %v553_v10 = vpack.c.bf16 %v1758_v9, %v1758_v9 }
 0x365   : > { %1445 = vmatmul.mubr.msk.bf16.vlgmr.msra.gmra.mrb[4].mxu0 %vm397_vm1, %v553_v10 }
 0x366   : > { %1455 = vmatpush3.bf16.xpose.msra.mxu0 %v699_v11  ;;  %1456 = vmatprep.mubr.msk.bf16.mxu0 %vm1587_vm0, %v1586_v1 }
 0x367   : > { %1466 = vmatprep.subr.bf16.mxu0 %v1586_v1 }
 0x36d   : > { %1457 = vmatmul.mubr.msk.bf16.vlgmr.msra.gmra.mrb[8].mxu0 %vm397_vm1, %v1713_v34 }
 0x36e   : > { %1467 = vmatpush3.bf16.xpose.msra.mxu0 %v826_v14  ;;  %1468 = vmatprep.mubr.msk.bf16.mxu0 %vm1587_vm0, %v1586_v1 }
 0x36f   : > { %1478 = vmatprep.subr.bf16.mxu0 %v1586_v1 }
 0x375   : > { %1469 = vmatmul.mubr.msk.bf16.vlgmr.msra.gmra.mrb[12].mxu0 %vm416_vm2, %v816_v16 }
 0x376   : > { %1480 = vmatprep.mubr.msk.bf16.mxu0 %vm1587_vm0, %v1586_v1 }
 0x39b   : > { %v675_v17 = vpop.permute.xlu1 %674 }
 0x39f   : > { %v677_v18 = vpop.permute.xlu1 %676 }
 0x3a0   : > { %v680_v19 = vsel %vm479_vm7, %v675_v17, %v677_v18 }
 0x3a1   : > { %v682_v21 = vsel %vm1720_vm8, %v680_v19, %v672_v2 }
 0x3a2   : > { %686 = vrot.lane.b32.xlu1 %v682_v21, %s1593_s14  ;;  %684 = vrot.lane.b32.xlu0 %v682_v21, %s1594_s15 }
 0x3a6   : > { %754 = vrot.lane.b32.xlu0 %v1786_v22, %s1588_s9 }
 0x3aa   : > { %900 = vrot.lane.b32.xlu0 %v1666_v3, %s1595_s16 }
 0x414   : > { %v685_v23 = vpop.permute.xlu0 %684  ;;  %v687_v24 = vpop.permute.xlu1 %686 }
 0x415   : > { %v690_v28 = vsel %vm491_vm10, %v685_v23, %v687_v24 }
 0x416   : > { %v692_v33 = vsel %vm1737_vm11, %v690_v28, %v682_v21 }
 0x417   : > { %v693_v34 = vunpack.c.l.bf16 %v692_v33 }
 0x418   : > { %v755_v25 = vpop.permute.xlu0 %754 }
 0x419   : > { %v760_v26 = vsel %vm557_vm12, %v755_v25, 0 }
 0x41a   : > { %1461 = vmatpush3.bf16.msra.mxu1 %v760_v26 }
 0x41b   : > { %1472 = vmatprep.subr.bf16.mxu1 %v1586_v1 }
 0x41c   : > { %v901_v47 = vpop.permute.xlu0 %900 }
 0x438   : > { %v1793_v27 = vpop.f32.mrb[4].mxu0 }
 0x439   : > { %v1446_v29 = vpop.f32.mrb[5].mxu0 }
 0x43a   : > { %v598_v31 = vpop.f32.mrb[6].mxu0 }
 0x43b   : > { %v1447_v32 = vpop.f32.mrb[7].mxu0 }
 0x440   : > { %v735_v35 = vpop.f32.mrb[8].mxu0 }
 0x441   : > { %v736_v36 = vadd.f32 %v735_v35, %v693_v34  ;;  %v1458_v37 = vpop.f32.mrb[9].mxu0 }
 0x442   : > { %v738_v39 = vpop.f32.mrb[10].mxu0 }
 0x443   : > { %v1459_v40 = vpop.f32.mrb[11].mxu0  ;;  %v741_v41 = vsel %vm397_vm1, %v736_v36, -inf }
 0x444   : > { %742 = vmax.xlane.f32.xlu1 %v741_v41 }
 0x448   : > { %v862_v42 = vpop.f32.mrb[12].mxu0 }
 0x449   : > { %v868_v43 = vpack.c.bf16 %v862_v42, %v862_v42  ;;  %v1470_v44 = vpop.f32.mrb[13].mxu0 }
 0x44a   : > { %v865_v45 = vpop.f32.mrb[14].mxu0 }
 0x44b   : > { %870 = vrot.lane.b32.xlu0 %v868_v43, %s1589_s10  ;;  %v1471_v46 = vpop.f32.mrb[15].mxu0 }
 0x44f   : > { %872 = vrot.lane.b32.xlu0 %v868_v43, %s1590_s11 }
 0x453   : > { %1020 = vrot.lane.b32.xlu0 %v1673_v4, %s1596_s23 }
 0x455   : > { %1022 = vrot.lane.b32.xlu1 %v1650_v0, %s1595_s16 }
 0x457   : > { %1016 = vrot.lane.b32.xlu0 %v1700_v20, %s1596_s23  ;;  %v905_v20 = vsel %vm397_vm1, %v901_v47, 0 }
 0x4bd   : > { %v871_v48 = vpop.permute.xlu0 %870 }
 0x4c1   : > { %v873_v49 = vpop.permute.xlu0 %872 }
 0x4c2   : > { %v876_v51 = vsel %vm467_vm4, %v871_v48, %v873_v49 }
 0x4c3   : > { %v878_v52 = vsel %vm1704_vm5, %v876_v51, %v868_v43 }
 0x4c4   : > { %880 = vrot.lane.b32.xlu0 %v878_v52, %s1592_s13 }
 0x4c5   : > { %v1021_v57 = vpop.permute.xlu0 %1020 }
 0x4c8   : > { %882 = vrot.lane.b32.xlu0 %v878_v52, %s1591_s12 }
 0x4c9   : > { %v1017_v60 = vpop.permute.xlu0 %1016 }
 0x4ca   : > { %v1019_v61 = vsel %vm397_vm1, %v1017_v60, %v901_v47 }
 0x4d1   : > { %v743_v53 = vpop.xlane.xlu1 %742 }
 0x4d2   : > { %v744_v4 = vsub.f32 %v736_v36, %v743_v53 }
 0x4d4   : > { %v745_v54 = vmul.f32 1.442695, %v744_v4 }
 0x4d5   : > { %v1023_v56 = vpop.permute.xlu1 %1022 }
 0x4d6   : > { %1547 = vpow2.f32 %v745_v54  ;;  %v1026_v58 = vsel %vm397_vm1, %v1021_v57, %v1023_v56 }
 0x4d7   : > { %v1029_v59 = vsel %vm416_vm2, %v1026_v58, 0 }
 0x4e0   : > { %v1548_v0 = vpop.eup %1547 }
 0x4e1   : > { %v750_v55 = vpack.c.bf16 %v1548_v0, %v1548_v0  ;;  %v747_v32 = vsel %vm397_vm1, %v1548_v0, 0.0 }
 0x4e3   : > { %1463 = vmatmul.mubr.msk.bf16.vlgmr.msra.gmra.mrb[8].mxu1 %vm397_vm1, %v750_v55 }
 0x4e4   : > { %1473 = vmatpush3.bf16.xpose.msra.mxu1 %v905_v20  ;;  %1474 = vmatprep.mubr.msk.bf16.mxu1 %vm1587_vm0, %v1586_v1 }
 0x4e5   : > { %1484 = vmatprep.subr.bf16.mxu1 %v1586_v1 }
 0x4eb   : > { %1475 = vmatmul.mubr.msk.bf16.vlgmr.msra.gmra.mrb[12].mxu1 %vm397_vm1, %v1774_v15 }
 0x4ec   : > { %1485 = vmatpush3.bf16.xpose.msra.mxu1 %v1029_v59  ;;  %1486 = vmatprep.mubr.msk.bf16.mxu1 %vm1587_vm0, %v1586_v1 }
 0x4ed   : > { %1496 = vmatprep.subr.bf16.mxu1 %v1586_v1 }
 0x4f3   : > { %1487 = vmatmul.mubr.msk.bf16.vlgmr.msra.gmra.mrb[16].mxu1 %vm416_vm2, %v1019_v61 }
 0x4f4   : > { %1498 = vmatprep.mubr.msk.bf16.mxu1 %vm1587_vm0, %v1586_v1 }
 0x536   : > { %v881_v62 = vpop.permute.xlu0 %880 }
 0x53a   : > { %v883_v63 = vpop.permute.xlu0 %882 }
 0x53b   : > { %v886_v2 = vsel %vm479_vm7, %v881_v62, %v883_v63 }
 0x53c   : > { %v888_v5 = vsel %vm1720_vm8, %v886_v2, %v878_v52 }
 0x53d   : > { %890 = vrot.lane.b32.xlu0 %v888_v5, %s1594_s15 }
 0x541   : > { %892 = vrot.lane.b32.xlu0 %v888_v5, %s1593_s14 }
 0x545   : > { %957 = vrot.lane.b32.xlu0 %v1786_v22, %s1595_s16 }
 0x549   : > { %1103 = vrot.lane.b32.xlu0 %v1666_v3, %s1596_s23 }
 0x5af   : > { %v891_v6 = vpop.permute.xlu0 %890 }
 0x5b3   : > { %v893_v7 = vpop.permute.xlu0 %892 }
 0x5b4   : > { %v896_v10 = vsel %vm491_vm10, %v891_v6, %v893_v7 }
 0x5b5   : > { %v898_v16 = vsel %vm1737_vm11, %v896_v10, %v888_v5 }
 0x5b6   : > { %v1838_v8 = vpop.f32.mrb[8].mxu1  ;;  %v899_v17 = vunpack.c.l.bf16 %v898_v16 }
 0x5b7   : > { %v1464_v11 = vpop.f32.mrb[9].mxu1  ;;  %v958_v12 = vpop.permute.xlu0 %957 }
 0x5b8   : > { %v799_v13 = vpop.f32.mrb[10].mxu1  ;;  %v963_v14 = vsel %vm557_vm12, %v958_v12, 0  ;;  %v550_v12 = vsel %vm397_vm1, %v1758_v9, 0.0 }
 0x5b9   : > { %v1465_v15 = vpop.f32.mrb[11].mxu1  ;;  %1479 = vmatpush3.bf16.msra.mxu0 %v963_v14 }
 0x5ba   : > { %1490 = vmatprep.subr.bf16.mxu0 %v1586_v1 }
 0x5bb   : > { %v1104_v33 = vpop.permute.xlu0 %1103 }
 0x5bc   : > { %v1108_v45 = vsel %vm397_vm1, %v1104_v33, 0 }
 0x5be   : > { %v941_v3 = vpop.f32.mrb[12].mxu1 }
 0x5bf   : > { %v942_v18 = vadd.f32 %v941_v3, %v899_v17  ;;  %v1476_v19 = vpop.f32.mrb[13].mxu1 }
 0x5c0   : > { %v944_v21 = vpop.f32.mrb[14].mxu1 }
 0x5c1   : > { %v1477_v23 = vpop.f32.mrb[15].mxu1  ;;  %v947_v24 = vsel %vm397_vm1, %v942_v18, -inf }
 0x5c2   : > { %948 = vmax.xlane.f32.xlu1 %v947_v24 }
 0x5c6   : > { %v1065_v25 = vpop.f32.mrb[16].mxu1 }
 0x5c7   : > { %v1071_v26 = vpack.c.bf16 %v1065_v25, %v1065_v25  ;;  %v1488_v28 = vpop.f32.mrb[17].mxu1 }
 0x5c8   : > { %v1068_v29 = vpop.f32.mrb[18].mxu1 }
 0x5c9   : > { %v1489_v31 = vpop.f32.mrb[19].mxu1  ;;  %1073 = vrot.lane.b32.xlu0 %v1071_v26, %s1589_s10 }
 0x5cd   : > { %1075 = vrot.lane.b32.xlu0 %v1071_v26, %s1590_s11 }
 0x5d3   : > { %1160 = vrot.lane.b32.xlu1 %v1786_v22, %s1596_s23 }
 0x5f7   : > { %748 = vadd.xlane.f32.xlu1 %v747_v32 }
 0x63b   : > { %v1074_v34 = vpop.permute.xlu0 %1073 }
 0x63f   : > { %v1076_v35 = vpop.permute.xlu0 %1075 }
 0x640   : > { %v1079_v36 = vsel %vm467_vm4, %v1074_v34, %v1076_v35 }
 0x641   : > { %v1081_v37 = vsel %vm1704_vm5, %v1079_v36, %v1071_v26 }
 0x642   : > { %1083 = vrot.lane.b32.xlu0 %v1081_v37, %s1592_s13 }
 0x646   : > { %1085 = vrot.lane.b32.xlu0 %v1081_v37, %s1591_s12 }
 0x64f   : > { %v949_v39 = vpop.xlane.xlu1 %948 }
 0x650   : > { %v950_v40 = vsub.f32 %v942_v18, %v949_v39 }
 0x652   : > { %v951_v41 = vmul.f32 1.442695, %v950_v40 }
 0x653   : > { %v1161_v42 = vpop.permute.xlu1 %1160 }
 0x654   : > { %1549 = vpow2.f32 %v951_v41  ;;  %v1166_v22 = vsel %vm557_vm12, %v1161_v42, 0 }
 0x655   : > { %1497 = vmatpush3.bf16.msra.mxu1 %v1166_v22 }
 0x65e   : > { %v1550_v43 = vpop.eup %1549 }
 0x65f   : > { %v956_v44 = vpack.c.bf16 %v1550_v43, %v1550_v43 }
 0x661   : > { %1481 = vmatmul.mubr.msk.bf16.vlgmr.msra.gmra.mrb[16].mxu0 %vm397_vm1, %v956_v44 }
 0x662   : > { %1491 = vmatpush3.bf16.xpose.msra.mxu0 %v1108_v45  ;;  %1492 = vmatprep.mubr.msk.bf16.mxu0 %vm1587_vm0, %v1586_v1  ;;  %vm1217_vm0 = vcmask 257216  }
 0x669   : > { %1493 = vmatmul.mubr.msk.bf16.vlgmr.msra.gmra.mrb[20].mxu0 %vm397_vm1, %v1017_v60  ;;  %v953_v60 = vsel %vm397_vm1, %v1550_v43, 0.0 }
 0x684   : > { %v749_v13 = vpop.xlane.xlu1 %748 }
 0x6b4   : > { %v1084_v30 = vpop.permute.xlu0 %1083 }
 0x6b8   : > { %v1086_v46 = vpop.permute.xlu0 %1085 }
 0x6b9   : > { %v1089_v47 = vsel %vm479_vm7, %v1084_v30, %v1086_v46 }
 0x6ba   : > { %v1091_v48 = vsel %vm1720_vm8, %v1089_v47, %v1081_v37 }
 0x6bb   : > { %1093 = vrot.lane.b32.xlu0 %v1091_v48, %s1594_s15 }
 0x6bf   : > { %1095 = vrot.lane.b32.xlu0 %v1091_v48, %s1593_s14 }
 0x72d   : > { %v1094_v49 = vpop.permute.xlu0 %1093 }
 0x731   : > { %v1096_v51 = vpop.permute.xlu0 %1095 }
 0x732   : > { %v1099_v53 = vsel %vm491_vm10, %v1094_v49, %v1096_v51 }
 0x733   : > { %v1101_v0 = vsel %vm1737_vm11, %v1099_v53, %v1091_v48 }
 0x734   : > { %v999_v52 = vpop.f32.mrb[16].mxu0  ;;  %v1102_v55 = vunpack.c.l.bf16 %v1101_v0 }
 0x735   : > { %v1482_v4 = vpop.f32.mrb[17].mxu0 }
 0x736   : > { %v1002_v1 = vpop.f32.mrb[18].mxu0 }
 0x737   : > { %v1483_v54 = vpop.f32.mrb[19].mxu0 }
 0x73c   : > { %v1144_v20 = vpop.f32.mrb[20].mxu0 }
 0x73d   : > { %v1145_v56 = vadd.f32 %v1144_v20, %v1102_v55  ;;  %v1494_v38 = vpop.f32.mrb[21].mxu0 }
 0x73e   : > { %v1147_v57 = vpop.f32.mrb[22].mxu0 }
 0x73f   : > { %v1495_v58 = vpop.f32.mrb[23].mxu0  ;;  %v1150_v59 = vsel %vm397_vm1, %v1145_v56, -inf }
 0x740   : > { %1151 = vmax.xlane.f32.xlu0 %v1150_v59 }
 0x744   : > { %954 = vadd.xlane.f32.xlu0 %v953_v60 }
 0x7cd   : > { %v1152_v61 = vpop.xlane.xlu0 %1151 }
 0x7ce   : > { %v1153_v62 = vsub.f32 %v1145_v56, %v1152_v61 }
 0x7d0   : > { %v1154_v63 = vmul.f32 1.442695, %v1153_v62 }
 0x7d1   : > { %v955_v2 = vpop.xlane.xlu0 %954 }
 0x7d2   : > { %1551 = vpow2.f32 %v1154_v63 }
 0x7d3   : > { %1553 = vrcp.f32 %v955_v2 }
 0x7d4   : > { %1555 = vrcp.f32 %v749_v13 }
 0x7dc   : > { %v1552_v50 = vpop.eup %1551 }
 0x7dd   : > { %v1554_v5 = vpop.eup %1553  ;;  %v1156_v6 = vsel %vm397_vm1, %v1552_v50, 0.0  ;;  %v1159_v7 = vpack.c.bf16 %v1552_v50, %v1552_v50 }
 0x7de   : > { %1157 = vadd.xlane.f32.xlu0 %v1156_v6  ;;  %v1006_v10 = vmul.f32 %v1554_v5, %v999_v52  ;;  %v1556_v14 = vpop.eup %1555 }
 0x7df   : > { %1499 = vmatmul.mubr.msk.bf16.vlgmr.msra.gmra.mrb[20].mxu1 %vm397_vm1, %v1159_v7  ;;  %v803_v15 = vmul.f32 %v1556_v14, %v1838_v8 }
 0x7e0   : > { %v1404_v11 = vpack.c.bf16 %v1006_v10, %v1006_v10 }
 0x7e1   : > { %v1403_v16 = vpack.c.bf16 %v803_v15, %v803_v15 }
 0x7e2   : > { %1011 = vrot.lane.b32.xlu1 %v1404_v11, %s1597_s26  ;;  %551 = vadd.xlane.f32.xlu0 %v550_v12 }
 0x7f8   : > { %808 = vrot.lane.b32.xlu0 %v1403_v16, %s1585_s24  ;;  %s1598_s24 = smov 24  }
 0x854   : > { %v1012_v8 = vpop.permute.xlu1 %1011 }
 0x86b   : > { %v1158_v17 = vpop.xlane.xlu0 %1157 }
 0x86f   : > { %v552_v3 = vpop.xlane.xlu0 %551 }
 0x870   : > { %1557 = vrcp.f32 %v552_v3 }
 0x871   : > { %1559 = vrcp.f32 %v1158_v17 }
 0x873   : > { %v809_v21 = vpop.permute.xlu0 %808 }
 0x87a   : > { %v1558_v18 = vpop.eup %1557 }
 0x87b   : > { %v602_v19 = vmul.f32 %v1558_v18, %v1793_v27  ;;  %v1560_v23 = vpop.eup %1559 }
 0x87d   : > { %v603_v9 = vpack.c.bf16 %v602_v19, %v602_v19 }
 0x87f   : > { %605 = vst.msk [vmem:[%s366_s29] sm:$0xf] %vm604_vm13, %v603_v9 }
 0x880   : > { %812 = vst.msk [vmem:[%s366_s29] sm:$0xf] %vm811_vm14, %v809_v21 }
 0x881   : > { %1015 = vst.msk [vmem:[%s366_s29] sm:$0xf] %vm1014_vm15, %v1012_v8 }
 0x8b2   : > { %v1202_v24 = vpop.f32.mrb[20].mxu1 }
 0x8b3   : > { %v1209_v25 = vmul.f32 %v1560_v23, %v1202_v24  ;;  %v1500_v26 = vpop.f32.mrb[21].mxu1 }
 0x8b4   : > { %v1205_v28 = vpop.f32.mrb[22].mxu1 }
 0x8b5   : > { %v1405_v27 = vpack.c.bf16 %v1209_v25, %v1209_v25  ;;  %v1501_v29 = vpop.f32.mrb[23].mxu1 }
 0x8b7   : > { %1214 = vrot.lane.b32.xlu0 %v1405_v27, %s1598_s24 }
 0x929   : > { %v1215_v31 = vpop.permute.xlu0 %1214 }
 0x92a   : > { %1218 = vst.msk [vmem:[%s366_s29] sm:$0xf] %vm1217_vm0, %v1215_v31 }
 0x92b PF: > { %s15_s20 = sadd.s32 1, %s1583_s20   ;;  %s1904_s18 = smov %s1579_s19 }
 0x92c   : > { %p12_p5 = scmp.ge.s32.totalorder %s15_s20, 4   ;;  %s1905_s19 = smov %s1907_s21 }
 0x92e   :  { %14 = sbr.rel (!%p12_p5) target bundleno = 2 (0x2), region = 82 }

</bundles_post_ra>
